<compile_context>
chip_gen: v7x
topology: tpu7x:2x2x1
jax: 0.10.0
libtpu: 0.0.40
codegen_flags: <defaults>
</compile_context>

<pallas_src>
import functools

import jax
import jax.numpy as jnp
from jax.experimental import pallas as pl
from jax.experimental.pallas import tpu as pltpu


def _sparse_decode_kernel(idx_ref, acts_ref, bdec_ref, wdec_hbm, out_ref,
                          rows_vmem, sems, *, num_k, k_pad):
    """out = acts(B, K_pad) @ W_dec[idx](K_pad, D) + b_dec(1, D)  (single step).

    idx_ref  : SMEM (K,) int32        -- scalar-prefetch operand
    acts_ref : VMEM (B, K_pad) f32    -- relu/clamped top activations, zero-padded
    bdec_ref : VMEM (1, D) f32
    wdec_hbm : HBM  (N, D) any dtype  -- raw ref, rows gathered via manual DMA
    out_ref  : VMEM (B, D) f32
    rows_vmem: VMEM (K_pad, D) scratch in W_dec's dtype
    sems     : DMA semaphores (K,)
    """
    # Zero the sublane-padding rows so the padded matmul never touches garbage
    # (padded activation columns are already zero, but 0 * NaN would still be NaN).
    if k_pad > num_k:
        rows_vmem[pl.ds(num_k, k_pad - num_k), :] = jnp.zeros(
            (k_pad - num_k, rows_vmem.shape[1]), rows_vmem.dtype)

    # Issue all K row gathers up front so the small DMAs overlap each other.
    copies = []
    for kk in range(num_k):
        cp = pltpu.make_async_copy(
            wdec_hbm.at[pl.ds(idx_ref[kk], 1), :],   # (1, D) HBM row idx[kk]
            rows_vmem.at[pl.ds(kk, 1), :],            # (1, D) staging row kk
            sems.at[kk])
        cp.start()
        copies.append(cp)
    for cp in copies:
        cp.wait()

    # In-kernel cast (halves gathered bytes when W_dec is bf16), then one MXU pass.
    rows = rows_vmem[...].astype(jnp.float32)                       # (K_pad, D)
    out_ref[...] = (
        jnp.dot(acts_ref[...], rows, preferred_element_type=jnp.float32)
        + bdec_ref[...])


def function_extractor_forward(weight, W_dec, b_dec, top_indices,
                               max_to_remove=None, max_to_add=None,
                               return_top_acts_and_top_indices=False,
                               sae_type='TopK'):
    if sae_type != 'TopK':
        # TODO(synk): non-TopK branch (dense select_weight + sae.decode(select_weight)) not implemented.
        raise NotImplementedError("only the TopK path is implemented")

    N, D = W_dec.shape
    K = int(top_indices.shape[0])
    idx = top_indices.astype(jnp.int32)

    # Gather FIRST (K-sized), cast/relu/clamp AFTER — never cast the dense arrays.
    base = jnp.maximum(weight[idx].astype(jnp.float32), 0.0)                  # (K,)
    if max_to_remove is not None:
        top_acts = jnp.minimum(base[None, :],
                               max_to_remove[:, idx].astype(jnp.float32))     # (B, K)
    elif max_to_add is not None:
        top_acts = jnp.maximum(
            base[None, :] - max_to_add[:, idx].astype(jnp.float32), 0.0)      # (B, K)
    else:
        top_acts = base[None, :]                                              # (1, K)
    B = top_acts.shape[0]

    # Sublane-aligned staging: pad K to a multiple of 8 with zero activations.
    K_pad = max(8, -(-K // 8) * 8)
    if K_pad == K:
        acts_pad = top_acts
    else:
        acts_pad = jnp.concatenate(
            [top_acts, jnp.zeros((B, K_pad - K), jnp.float32)], axis=1)
    bdec = b_dec.astype(jnp.float32).reshape(1, D)

    itemsize = jnp.dtype(W_dec.dtype).itemsize
    kernel = functools.partial(_sparse_decode_kernel, num_k=K, k_pad=K_pad)
    func_vec = pl.pallas_call(
        kernel,
        out_shape=jax.ShapeDtypeStruct((B, D), jnp.float32),
        grid_spec=pltpu.PrefetchScalarGridSpec(
            num_scalar_prefetch=1,
            grid=(1,),
            in_specs=[
                # (B, K_pad) activations: whole tiny array in VMEM.
                pl.BlockSpec((B, K_pad), lambda i, idx_ref: (0, 0)),
                # (1, D) decoder bias.
                pl.BlockSpec((1, D), lambda i, idx_ref: (0, 0)),
                # W_dec stays in HBM; only the K selected rows are DMA'd manually.
                pl.BlockSpec(memory_space=pl.ANY),
            ],
            out_specs=pl.BlockSpec((B, D), lambda i, idx_ref: (0, 0)),
            scratch_shapes=[
                pltpu.VMEM((K_pad, D), W_dec.dtype),     # gathered-row staging
                pltpu.SemaphoreType.DMA((K,)),           # one sem per row copy
            ],
        ),
        compiler_params=pltpu.CompilerParams(
            dimension_semantics=("arbitrary",)),
        cost_estimate=pl.CostEstimate(
            flops=2 * B * K * D,
            transcendentals=0,
            bytes_accessed=K * D * itemsize + 4 * (B * K_pad + D + B * D)),
    )(idx, acts_pad, bdec, W_dec)

    if return_top_acts_and_top_indices:
        return func_vec, top_acts, top_indices
    return func_vec


def _reference_forward(weight, W_dec, b_dec, top_indices,
                       max_to_remove=None, max_to_add=None):
    ta = jnp.maximum(weight[top_indices], 0.0)
    if max_to_remove is not None:
        ta = jnp.minimum(ta[None, :], max_to_remove[:, top_indices])
    elif max_to_add is not None:
        ta = jnp.maximum(ta[None, :] - max_to_add[:, top_indices], 0.0)
    else:
        ta = ta[None, :]
    return ta @ W_dec[top_indices].astype(jnp.float32) + b_dec[None, :], ta


if __name__ == "__main__":
    key = jax.random.PRNGKey(0)
    k1, k2, k3, k4, k5 = jax.random.split(key, 5)

    num_activations = 512   # SAE latent dim (N)
    d_model = 384           # decoded model dim (D)
    K = 8                   # number of top indices
    B = 2                   # batch of max_to_remove / max_to_add

    # deterministic "parameters" (torch init: uniform(1e-5, 2e-5) for weight)
    weight = jax.random.uniform(k1, (num_activations,), jnp.float32, 1e-5, 2e-5)
    W_dec = 0.02 * jax.random.normal(k2, (num_activations, d_model), jnp.float32)
    b_dec = 0.01 * jax.random.normal(k3, (d_model,), jnp.float32)

    top_indices = jax.random.permutation(k4, num_activations)[:K].astype(jnp.int32)
    max_mat = jax.random.uniform(k5, (B, num_activations), jnp.float32, 0.0, 3e-5)

    # path 1: no clamp (top_acts unsqueezed -> batch 1)
    out0 = function_extractor_forward(weight, W_dec, b_dec, top_indices)
    # path 2: max_to_remove clamp, also return acts/indices
    out1, acts1, idx1 = function_extractor_forward(
        weight, W_dec, b_dec, top_indices, max_to_remove=max_mat,
        return_top_acts_and_top_indices=True)
    # path 3: max_to_add clamp
    out2 = function_extractor_forward(weight, W_dec, b_dec, top_indices,
                                      max_to_add=max_mat)
    # path 4: small, non-128-multiple d_model (full-D block; tiny masked store)
    d_small = 96
    W_dec_s = 0.02 * jax.random.normal(k2, (num_activations, d_small), jnp.float32)
    b_dec_s = 0.01 * jax.random.normal(k3, (d_small,), jnp.float32)
    out3 = function_extractor_forward(weight, W_dec_s, b_dec_s, top_indices,
                                      max_to_remove=max_mat)
    # path 5: K not a multiple of 8 -> exercises zero-padded staging rows
    top_idx5 = top_indices[:5]
    out4 = function_extractor_forward(weight, W_dec, b_dec, top_idx5,
                                      max_to_remove=max_mat)

    jax.block_until_ready((out0, out1, acts1, out2, out3, out4))

    ref0, _ = _reference_forward(weight, W_dec, b_dec, top_indices)
    ref1, ref_acts1 = _reference_forward(weight, W_dec, b_dec, top_indices,
                                         max_to_remove=max_mat)
    ref2, _ = _reference_forward(weight, W_dec, b_dec, top_indices,
                                 max_to_add=max_mat)
    ref3, _ = _reference_forward(weight, W_dec_s, b_dec_s, top_indices,
                                 max_to_remove=max_mat)
    ref4, _ = _reference_forward(weight, W_dec, b_dec, top_idx5,
                                 max_to_remove=max_mat)

    assert out0.shape == (1, d_model)
    assert out1.shape == (B, d_model) and out2.shape == (B, d_model)
    assert out3.shape == (B, d_small) and out4.shape == (B, d_model)
    assert jnp.array_equal(idx1, top_indices)
    assert jnp.allclose(out0, ref0, atol=1e-6, rtol=1e-4)
    assert jnp.allclose(out1, ref1, atol=1e-6, rtol=1e-4)
    assert jnp.allclose(acts1, ref_acts1, atol=1e-7, rtol=1e-4)
    assert jnp.allclose(out2, ref2, atol=1e-6, rtol=1e-4)
    assert jnp.allclose(out3, ref3, atol=1e-6, rtol=1e-4)
    assert jnp.allclose(out4, ref4, atol=1e-6, rtol=1e-4)

    print("KERNEL_OK")
</pallas_src>

<mosaic_0001>
module attributes {stable_mosaic.version = 11 : i64} {
  func.func @_sparse_decode_kernel(%arg0: i32, %arg1: memref<8xi32, #tpu.memory_space<smem>>, %arg2: memref<1x8xf32, #tpu.memory_space<vmem>>, %arg3: memref<1x384xf32, #tpu.memory_space<vmem>>, %arg4: memref<512x384xf32, #tpu.memory_space<any>>, %arg5: memref<1x384xf32, #tpu.memory_space<vmem>>, %arg6: memref<8x384xf32, #tpu.memory_space<vmem>>, %arg7: memref<8x!tpu.dma_semaphore, #tpu.memory_space<semaphore_mem>>) attributes {dimension_semantics = [#tpu.dimension_semantics<arbitrary>], iteration_bounds = array<i64: 1>, scalar_prefetch = 1 : i64, scratch_operands = 2 : i64, tpu.core_type = #tpu.core_type<tc>, window_params = [{pipeline_mode = #tpu.pipeline_mode<synchronous>, transform_indices = @transform_0, window_bounds = array<i64: 1, 8>}, {pipeline_mode = #tpu.pipeline_mode<synchronous>, transform_indices = @transform_1, window_bounds = array<i64: 1, 384>}, {}, {pipeline_mode = #tpu.pipeline_mode<synchronous>, transform_indices = @transform_3, window_bounds = array<i64: 1, 384>}]} {
    %c0 = arith.constant 0 : index
    %0 = memref.load %arg1[%c0] : memref<8xi32, #tpu.memory_space<smem>>
    %c0_i32 = arith.constant 0 : i32
    %c0_i32_0 = arith.constant 0 : i32
    %1 = tpu.memref_slice %arg4[%0, %c0_i32_0] : memref<512x384xf32, #tpu.memory_space<any>> -> memref<1x384xf32, #tpu.memory_space<any>>
    %c0_i32_1 = arith.constant 0 : i32
    %c0_i32_2 = arith.constant 0 : i32
    %2 = tpu.memref_slice %arg6[%c0_i32_1, %c0_i32_2] : memref<8x384xf32, #tpu.memory_space<vmem>> -> memref<1x384xf32, #tpu.memory_space<vmem>>
    %3 = tpu.memref_slice %arg7[%c0_i32] : memref<8x!tpu.dma_semaphore, #tpu.memory_space<semaphore_mem>> -> memref<1x!tpu.dma_semaphore, #tpu.memory_space<semaphore_mem>>
    %4 = tpu.memref_squeeze %3 : memref<1x!tpu.dma_semaphore, #tpu.memory_space<semaphore_mem>> -> memref<!tpu.dma_semaphore, #tpu.memory_space<semaphore_mem>>
    tpu.enqueue_dma source(%1 : memref<1x384xf32, #tpu.memory_space<any>>) target(%2 : memref<1x384xf32, #tpu.memory_space<vmem>>) target_semaphore(%4 : memref<!tpu.dma_semaphore, #tpu.memory_space<semaphore_mem>>)
    %c1 = arith.constant 1 : index
    %5 = memref.load %arg1[%c1] : memref<8xi32, #tpu.memory_space<smem>>
    %c1_i32 = arith.constant 1 : i32
    %c0_i32_3 = arith.constant 0 : i32
    %6 = tpu.memref_slice %arg4[%5, %c0_i32_3] : memref<512x384xf32, #tpu.memory_space<any>> -> memref<1x384xf32, #tpu.memory_space<any>>
    %c1_i32_4 = arith.constant 1 : i32
    %c0_i32_5 = arith.constant 0 : i32
    %7 = tpu.memref_slice %arg6[%c1_i32_4, %c0_i32_5] : memref<8x384xf32, #tpu.memory_space<vmem>> -> memref<1x384xf32, #tpu.memory_space<vmem>>
    %8 = tpu.memref_slice %arg7[%c1_i32] : memref<8x!tpu.dma_semaphore, #tpu.memory_space<semaphore_mem>> -> memref<1x!tpu.dma_semaphore, #tpu.memory_space<semaphore_mem>>
    %9 = tpu.memref_squeeze %8 : memref<1x!tpu.dma_semaphore, #tpu.memory_space<semaphore_mem>> -> memref<!tpu.dma_semaphore, #tpu.memory_space<semaphore_mem>>
    tpu.enqueue_dma source(%6 : memref<1x384xf32, #tpu.memory_space<any>>) target(%7 : memref<1x384xf32, #tpu.memory_space<vmem>>) target_semaphore(%9 : memref<!tpu.dma_semaphore, #tpu.memory_space<semaphore_mem>>)
    %c2 = arith.constant 2 : index
    %10 = memref.load %arg1[%c2] : memref<8xi32, #tpu.memory_space<smem>>
    %c2_i32 = arith.constant 2 : i32
    %c0_i32_6 = arith.constant 0 : i32
    %11 = tpu.memref_slice %arg4[%10, %c0_i32_6] : memref<512x384xf32, #tpu.memory_space<any>> -> memref<1x384xf32, #tpu.memory_space<any>>
    %c2_i32_7 = arith.constant 2 : i32
    %c0_i32_8 = arith.constant 0 : i32
    %12 = tpu.memref_slice %arg6[%c2_i32_7, %c0_i32_8] : memref<8x384xf32, #tpu.memory_space<vmem>> -> memref<1x384xf32, #tpu.memory_space<vmem>>
    %13 = tpu.memref_slice %arg7[%c2_i32] : memref<8x!tpu.dma_semaphore, #tpu.memory_space<semaphore_mem>> -> memref<1x!tpu.dma_semaphore, #tpu.memory_space<semaphore_mem>>
    %14 = tpu.memref_squeeze %13 : memref<1x!tpu.dma_semaphore, #tpu.memory_space<semaphore_mem>> -> memref<!tpu.dma_semaphore, #tpu.memory_space<semaphore_mem>>
    tpu.enqueue_dma source(%11 : memref<1x384xf32, #tpu.memory_space<any>>) target(%12 : memref<1x384xf32, #tpu.memory_space<vmem>>) target_semaphore(%14 : memref<!tpu.dma_semaphore, #tpu.memory_space<semaphore_mem>>)
    %c3 = arith.constant 3 : index
    %15 = memref.load %arg1[%c3] : memref<8xi32, #tpu.memory_space<smem>>
    %c3_i32 = arith.constant 3 : i32
    %c0_i32_9 = arith.constant 0 : i32
    %16 = tpu.memref_slice %arg4[%15, %c0_i32_9] : memref<512x384xf32, #tpu.memory_space<any>> -> memref<1x384xf32, #tpu.memory_space<any>>
    %c3_i32_10 = arith.constant 3 : i32
    %c0_i32_11 = arith.constant 0 : i32
    %17 = tpu.memref_slice %arg6[%c3_i32_10, %c0_i32_11] : memref<8x384xf32, #tpu.memory_space<vmem>> -> memref<1x384xf32, #tpu.memory_space<vmem>>
    %18 = tpu.memref_slice %arg7[%c3_i32] : memref<8x!tpu.dma_semaphore, #tpu.memory_space<semaphore_mem>> -> memref<1x!tpu.dma_semaphore, #tpu.memory_space<semaphore_mem>>
    %19 = tpu.memref_squeeze %18 : memref<1x!tpu.dma_semaphore, #tpu.memory_space<semaphore_mem>> -> memref<!tpu.dma_semaphore, #tpu.memory_space<semaphore_mem>>
    tpu.enqueue_dma source(%16 : memref<1x384xf32, #tpu.memory_space<any>>) target(%17 : memref<1x384xf32, #tpu.memory_space<vmem>>) target_semaphore(%19 : memref<!tpu.dma_semaphore, #tpu.memory_space<semaphore_mem>>)
    %c4 = arith.constant 4 : index
    %20 = memref.load %arg1[%c4] : memref<8xi32, #tpu.memory_space<smem>>
    %c4_i32 = arith.constant 4 : i32
    %c0_i32_12 = arith.constant 0 : i32
    %21 = tpu.memref_slice %arg4[%20, %c0_i32_12] : memref<512x384xf32, #tpu.memory_space<any>> -> memref<1x384xf32, #tpu.memory_space<any>>
    %c4_i32_13 = arith.constant 4 : i32
    %c0_i32_14 = arith.constant 0 : i32
    %22 = tpu.memref_slice %arg6[%c4_i32_13, %c0_i32_14] : memref<8x384xf32, #tpu.memory_space<vmem>> -> memref<1x384xf32, #tpu.memory_space<vmem>>
    %23 = tpu.memref_slice %arg7[%c4_i32] : memref<8x!tpu.dma_semaphore, #tpu.memory_space<semaphore_mem>> -> memref<1x!tpu.dma_semaphore, #tpu.memory_space<semaphore_mem>>
    %24 = tpu.memref_squeeze %23 : memref<1x!tpu.dma_semaphore, #tpu.memory_space<semaphore_mem>> -> memref<!tpu.dma_semaphore, #tpu.memory_space<semaphore_mem>>
    tpu.enqueue_dma source(%21 : memref<1x384xf32, #tpu.memory_space<any>>) target(%22 : memref<1x384xf32, #tpu.memory_space<vmem>>) target_semaphore(%24 : memref<!tpu.dma_semaphore, #tpu.memory_space<semaphore_mem>>)
    %c5 = arith.constant 5 : index
    %25 = memref.load %arg1[%c5] : memref<8xi32, #tpu.memory_space<smem>>
    %c5_i32 = arith.constant 5 : i32
    %c0_i32_15 = arith.constant 0 : i32
    %26 = tpu.memref_slice %arg4[%25, %c0_i32_15] : memref<512x384xf32, #tpu.memory_space<any>> -> memref<1x384xf32, #tpu.memory_space<any>>
    %c5_i32_16 = arith.constant 5 : i32
    %c0_i32_17 = arith.constant 0 : i32
    %27 = tpu.memref_slice %arg6[%c5_i32_16, %c0_i32_17] : memref<8x384xf32, #tpu.memory_space<vmem>> -> memref<1x384xf32, #tpu.memory_space<vmem>>
    %28 = tpu.memref_slice %arg7[%c5_i32] : memref<8x!tpu.dma_semaphore, #tpu.memory_space<semaphore_mem>> -> memref<1x!tpu.dma_semaphore, #tpu.memory_space<semaphore_mem>>
    %29 = tpu.memref_squeeze %28 : memref<1x!tpu.dma_semaphore, #tpu.memory_space<semaphore_mem>> -> memref<!tpu.dma_semaphore, #tpu.memory_space<semaphore_mem>>
    tpu.enqueue_dma source(%26 : memref<1x384xf32, #tpu.memory_space<any>>) target(%27 : memref<1x384xf32, #tpu.memory_space<vmem>>) target_semaphore(%29 : memref<!tpu.dma_semaphore, #tpu.memory_space<semaphore_mem>>)
    %c6 = arith.constant 6 : index
    %30 = memref.load %arg1[%c6] : memref<8xi32, #tpu.memory_space<smem>>
    %c6_i32 = arith.constant 6 : i32
    %c0_i32_18 = arith.constant 0 : i32
    %31 = tpu.memref_slice %arg4[%30, %c0_i32_18] : memref<512x384xf32, #tpu.memory_space<any>> -> memref<1x384xf32, #tpu.memory_space<any>>
    %c6_i32_19 = arith.constant 6 : i32
    %c0_i32_20 = arith.constant 0 : i32
    %32 = tpu.memref_slice %arg6[%c6_i32_19, %c0_i32_20] : memref<8x384xf32, #tpu.memory_space<vmem>> -> memref<1x384xf32, #tpu.memory_space<vmem>>
    %33 = tpu.memref_slice %arg7[%c6_i32] : memref<8x!tpu.dma_semaphore, #tpu.memory_space<semaphore_mem>> -> memref<1x!tpu.dma_semaphore, #tpu.memory_space<semaphore_mem>>
    %34 = tpu.memref_squeeze %33 : memref<1x!tpu.dma_semaphore, #tpu.memory_space<semaphore_mem>> -> memref<!tpu.dma_semaphore, #tpu.memory_space<semaphore_mem>>
    tpu.enqueue_dma source(%31 : memref<1x384xf32, #tpu.memory_space<any>>) target(%32 : memref<1x384xf32, #tpu.memory_space<vmem>>) target_semaphore(%34 : memref<!tpu.dma_semaphore, #tpu.memory_space<semaphore_mem>>)
    %c7 = arith.constant 7 : index
    %35 = memref.load %arg1[%c7] : memref<8xi32, #tpu.memory_space<smem>>
    %c7_i32 = arith.constant 7 : i32
    %c0_i32_21 = arith.constant 0 : i32
    %36 = tpu.memref_slice %arg4[%35, %c0_i32_21] : memref<512x384xf32, #tpu.memory_space<any>> -> memref<1x384xf32, #tpu.memory_space<any>>
    %c7_i32_22 = arith.constant 7 : i32
    %c0_i32_23 = arith.constant 0 : i32
    %37 = tpu.memref_slice %arg6[%c7_i32_22, %c0_i32_23] : memref<8x384xf32, #tpu.memory_space<vmem>> -> memref<1x384xf32, #tpu.memory_space<vmem>>
    %38 = tpu.memref_slice %arg7[%c7_i32] : memref<8x!tpu.dma_semaphore, #tpu.memory_space<semaphore_mem>> -> memref<1x!tpu.dma_semaphore, #tpu.memory_space<semaphore_mem>>
    %39 = tpu.memref_squeeze %38 : memref<1x!tpu.dma_semaphore, #tpu.memory_space<semaphore_mem>> -> memref<!tpu.dma_semaphore, #tpu.memory_space<semaphore_mem>>
    tpu.enqueue_dma source(%36 : memref<1x384xf32, #tpu.memory_space<any>>) target(%37 : memref<1x384xf32, #tpu.memory_space<vmem>>) target_semaphore(%39 : memref<!tpu.dma_semaphore, #tpu.memory_space<semaphore_mem>>)
    %c0_i32_24 = arith.constant 0 : i32
    %c0_i32_25 = arith.constant 0 : i32
    %40 = tpu.memref_slice %arg4[%0, %c0_i32_25] : memref<512x384xf32, #tpu.memory_space<any>> -> memref<1x384xf32, #tpu.memory_space<any>>
    %c0_i32_26 = arith.constant 0 : i32
    %c0_i32_27 = arith.constant 0 : i32
    %41 = tpu.memref_slice %arg6[%c0_i32_26, %c0_i32_27] : memref<8x384xf32, #tpu.memory_space<vmem>> -> memref<1x384xf32, #tpu.memory_space<vmem>>
    %42 = tpu.memref_slice %arg7[%c0_i32_24] : memref<8x!tpu.dma_semaphore, #tpu.memory_space<semaphore_mem>> -> memref<1x!tpu.dma_semaphore, #tpu.memory_space<semaphore_mem>>
    %43 = tpu.memref_squeeze %42 : memref<1x!tpu.dma_semaphore, #tpu.memory_space<semaphore_mem>> -> memref<!tpu.dma_semaphore, #tpu.memory_space<semaphore_mem>>
    tpu.wait_dma2 semaphore(%43 : memref<!tpu.dma_semaphore, #tpu.memory_space<semaphore_mem>>) src(%40 : memref<1x384xf32, #tpu.memory_space<any>>) dst(%41 : memref<1x384xf32, #tpu.memory_space<vmem>>)
    %c1_i32_28 = arith.constant 1 : i32
    %c0_i32_29 = arith.constant 0 : i32
    %44 = tpu.memref_slice %arg4[%5, %c0_i32_29] : memref<512x384xf32, #tpu.memory_space<any>> -> memref<1x384xf32, #tpu.memory_space<any>>
    %c1_i32_30 = arith.constant 1 : i32
    %c0_i32_31 = arith.constant 0 : i32
    %45 = tpu.memref_slice %arg6[%c1_i32_30, %c0_i32_31] : memref<8x384xf32, #tpu.memory_space<vmem>> -> memref<1x384xf32, #tpu.memory_space<vmem>>
    %46 = tpu.memref_slice %arg7[%c1_i32_28] : memref<8x!tpu.dma_semaphore, #tpu.memory_space<semaphore_mem>> -> memref<1x!tpu.dma_semaphore, #tpu.memory_space<semaphore_mem>>
    %47 = tpu.memref_squeeze %46 : memref<1x!tpu.dma_semaphore, #tpu.memory_space<semaphore_mem>> -> memref<!tpu.dma_semaphore, #tpu.memory_space<semaphore_mem>>
    tpu.wait_dma2 semaphore(%47 : memref<!tpu.dma_semaphore, #tpu.memory_space<semaphore_mem>>) src(%44 : memref<1x384xf32, #tpu.memory_space<any>>) dst(%45 : memref<1x384xf32, #tpu.memory_space<vmem>>)
    %c2_i32_32 = arith.constant 2 : i32
    %c0_i32_33 = arith.constant 0 : i32
    %48 = tpu.memref_slice %arg4[%10, %c0_i32_33] : memref<512x384xf32, #tpu.memory_space<any>> -> memref<1x384xf32, #tpu.memory_space<any>>
    %c2_i32_34 = arith.constant 2 : i32
    %c0_i32_35 = arith.constant 0 : i32
    %49 = tpu.memref_slice %arg6[%c2_i32_34, %c0_i32_35] : memref<8x384xf32, #tpu.memory_space<vmem>> -> memref<1x384xf32, #tpu.memory_space<vmem>>
    %50 = tpu.memref_slice %arg7[%c2_i32_32] : memref<8x!tpu.dma_semaphore, #tpu.memory_space<semaphore_mem>> -> memref<1x!tpu.dma_semaphore, #tpu.memory_space<semaphore_mem>>
    %51 = tpu.memref_squeeze %50 : memref<1x!tpu.dma_semaphore, #tpu.memory_space<semaphore_mem>> -> memref<!tpu.dma_semaphore, #tpu.memory_space<semaphore_mem>>
    tpu.wait_dma2 semaphore(%51 : memref<!tpu.dma_semaphore, #tpu.memory_space<semaphore_mem>>) src(%48 : memref<1x384xf32, #tpu.memory_space<any>>) dst(%49 : memref<1x384xf32, #tpu.memory_space<vmem>>)
    %c3_i32_36 = arith.constant 3 : i32
    %c0_i32_37 = arith.constant 0 : i32
    %52 = tpu.memref_slice %arg4[%15, %c0_i32_37] : memref<512x384xf32, #tpu.memory_space<any>> -> memref<1x384xf32, #tpu.memory_space<any>>
    %c3_i32_38 = arith.constant 3 : i32
    %c0_i32_39 = arith.constant 0 : i32
    %53 = tpu.memref_slice %arg6[%c3_i32_38, %c0_i32_39] : memref<8x384xf32, #tpu.memory_space<vmem>> -> memref<1x384xf32, #tpu.memory_space<vmem>>
    %54 = tpu.memref_slice %arg7[%c3_i32_36] : memref<8x!tpu.dma_semaphore, #tpu.memory_space<semaphore_mem>> -> memref<1x!tpu.dma_semaphore, #tpu.memory_space<semaphore_mem>>
    %55 = tpu.memref_squeeze %54 : memref<1x!tpu.dma_semaphore, #tpu.memory_space<semaphore_mem>> -> memref<!tpu.dma_semaphore, #tpu.memory_space<semaphore_mem>>
    tpu.wait_dma2 semaphore(%55 : memref<!tpu.dma_semaphore, #tpu.memory_space<semaphore_mem>>) src(%52 : memref<1x384xf32, #tpu.memory_space<any>>) dst(%53 : memref<1x384xf32, #tpu.memory_space<vmem>>)
    %c4_i32_40 = arith.constant 4 : i32
    %c0_i32_41 = arith.constant 0 : i32
    %56 = tpu.memref_slice %arg4[%20, %c0_i32_41] : memref<512x384xf32, #tpu.memory_space<any>> -> memref<1x384xf32, #tpu.memory_space<any>>
    %c4_i32_42 = arith.constant 4 : i32
    %c0_i32_43 = arith.constant 0 : i32
    %57 = tpu.memref_slice %arg6[%c4_i32_42, %c0_i32_43] : memref<8x384xf32, #tpu.memory_space<vmem>> -> memref<1x384xf32, #tpu.memory_space<vmem>>
    %58 = tpu.memref_slice %arg7[%c4_i32_40] : memref<8x!tpu.dma_semaphore, #tpu.memory_space<semaphore_mem>> -> memref<1x!tpu.dma_semaphore, #tpu.memory_space<semaphore_mem>>
    %59 = tpu.memref_squeeze %58 : memref<1x!tpu.dma_semaphore, #tpu.memory_space<semaphore_mem>> -> memref<!tpu.dma_semaphore, #tpu.memory_space<semaphore_mem>>
    tpu.wait_dma2 semaphore(%59 : memref<!tpu.dma_semaphore, #tpu.memory_space<semaphore_mem>>) src(%56 : memref<1x384xf32, #tpu.memory_space<any>>) dst(%57 : memref<1x384xf32, #tpu.memory_space<vmem>>)
    %c5_i32_44 = arith.constant 5 : i32
    %c0_i32_45 = arith.constant 0 : i32
    %60 = tpu.memref_slice %arg4[%25, %c0_i32_45] : memref<512x384xf32, #tpu.memory_space<any>> -> memref<1x384xf32, #tpu.memory_space<any>>
    %c5_i32_46 = arith.constant 5 : i32
    %c0_i32_47 = arith.constant 0 : i32
    %61 = tpu.memref_slice %arg6[%c5_i32_46, %c0_i32_47] : memref<8x384xf32, #tpu.memory_space<vmem>> -> memref<1x384xf32, #tpu.memory_space<vmem>>
    %62 = tpu.memref_slice %arg7[%c5_i32_44] : memref<8x!tpu.dma_semaphore, #tpu.memory_space<semaphore_mem>> -> memref<1x!tpu.dma_semaphore, #tpu.memory_space<semaphore_mem>>
    %63 = tpu.memref_squeeze %62 : memref<1x!tpu.dma_semaphore, #tpu.memory_space<semaphore_mem>> -> memref<!tpu.dma_semaphore, #tpu.memory_space<semaphore_mem>>
    tpu.wait_dma2 semaphore(%63 : memref<!tpu.dma_semaphore, #tpu.memory_space<semaphore_mem>>) src(%60 : memref<1x384xf32, #tpu.memory_space<any>>) dst(%61 : memref<1x384xf32, #tpu.memory_space<vmem>>)
    %c6_i32_48 = arith.constant 6 : i32
    %c0_i32_49 = arith.constant 0 : i32
    %64 = tpu.memref_slice %arg4[%30, %c0_i32_49] : memref<512x384xf32, #tpu.memory_space<any>> -> memref<1x384xf32, #tpu.memory_space<any>>
    %c6_i32_50 = arith.constant 6 : i32
    %c0_i32_51 = arith.constant 0 : i32
    %65 = tpu.memref_slice %arg6[%c6_i32_50, %c0_i32_51] : memref<8x384xf32, #tpu.memory_space<vmem>> -> memref<1x384xf32, #tpu.memory_space<vmem>>
    %66 = tpu.memref_slice %arg7[%c6_i32_48] : memref<8x!tpu.dma_semaphore, #tpu.memory_space<semaphore_mem>> -> memref<1x!tpu.dma_semaphore, #tpu.memory_space<semaphore_mem>>
    %67 = tpu.memref_squeeze %66 : memref<1x!tpu.dma_semaphore, #tpu.memory_space<semaphore_mem>> -> memref<!tpu.dma_semaphore, #tpu.memory_space<semaphore_mem>>
    tpu.wait_dma2 semaphore(%67 : memref<!tpu.dma_semaphore, #tpu.memory_space<semaphore_mem>>) src(%64 : memref<1x384xf32, #tpu.memory_space<any>>) dst(%65 : memref<1x384xf32, #tpu.memory_space<vmem>>)
    %c7_i32_52 = arith.constant 7 : i32
    %c0_i32_53 = arith.constant 0 : i32
    %68 = tpu.memref_slice %arg4[%35, %c0_i32_53] : memref<512x384xf32, #tpu.memory_space<any>> -> memref<1x384xf32, #tpu.memory_space<any>>
    %c7_i32_54 = arith.constant 7 : i32
    %c0_i32_55 = arith.constant 0 : i32
    %69 = tpu.memref_slice %arg6[%c7_i32_54, %c0_i32_55] : memref<8x384xf32, #tpu.memory_space<vmem>> -> memref<1x384xf32, #tpu.memory_space<vmem>>
    %70 = tpu.memref_slice %arg7[%c7_i32_52] : memref<8x!tpu.dma_semaphore, #tpu.memory_space<semaphore_mem>> -> memref<1x!tpu.dma_semaphore, #tpu.memory_space<semaphore_mem>>
    %71 = tpu.memref_squeeze %70 : memref<1x!tpu.dma_semaphore, #tpu.memory_space<semaphore_mem>> -> memref<!tpu.dma_semaphore, #tpu.memory_space<semaphore_mem>>
    tpu.wait_dma2 semaphore(%71 : memref<!tpu.dma_semaphore, #tpu.memory_space<semaphore_mem>>) src(%68 : memref<1x384xf32, #tpu.memory_space<any>>) dst(%69 : memref<1x384xf32, #tpu.memory_space<vmem>>)
    %c0_56 = arith.constant 0 : index
    %c0_57 = arith.constant 0 : index
    %72 = vector.load %arg6[%c0_56, %c0_57] : memref<8x384xf32, #tpu.memory_space<vmem>>, vector<8x384xf32>
    %c0_58 = arith.constant 0 : index
    %c0_59 = arith.constant 0 : index
    %73 = vector.load %arg2[%c0_58, %c0_59] : memref<1x8xf32, #tpu.memory_space<vmem>>, vector<1x8xf32>
    %cst = arith.constant dense<0.000000e+00> : vector<1x384xf32>
    %74 = tpu.matmul %73, %72, %cst {dimension_numbers = #tpu.dot_dimension_numbers<[1], [0], [0], [1], [0, 0, 1, 1], [], []>} : vector<1x8xf32>, vector<8x384xf32>, vector<1x384xf32> -> vector<1x384xf32>
    %c0_60 = arith.constant 0 : index
    %c0_61 = arith.constant 0 : index
    %75 = vector.load %arg3[%c0_60, %c0_61] : memref<1x384xf32, #tpu.memory_space<vmem>>, vector<1x384xf32>
    %76 = arith.addf %74, %75 : vector<1x384xf32>
    %c0_62 = arith.constant 0 : index
    %c0_63 = arith.constant 0 : index
    %77 = vector.load %arg5[%c0_62, %c0_63] : memref<1x384xf32, #tpu.memory_space<vmem>>, vector<1x384xf32>
    tpu.vector_store %arg5[%c0_62, %c0_63], %76 {strides = array<i32>} : memref<1x384xf32, #tpu.memory_space<vmem>>, vector<1x384xf32>,
    return
  }
  func.func @transform_0(%arg0: i32, %arg1: memref<8xi32, #tpu.memory_space<smem>>) -> (i32, i32) {
    %c0_i32 = arith.constant 0 : i32
    %c0_i32_0 = arith.constant 0 : i32
    %c0_i32_1 = arith.constant 0 : i32
    return %c0_i32, %c0_i32_0 : i32, i32
  }
  func.func @transform_1(%arg0: i32, %arg1: memref<8xi32, #tpu.memory_space<smem>>) -> (i32, i32) {
    %c0_i32 = arith.constant 0 : i32
    %c0_i32_0 = arith.constant 0 : i32
    %c0_i32_1 = arith.constant 0 : i32
    return %c0_i32, %c0_i32_0 : i32, i32
  }
  func.func @transform_3(%arg0: i32, %arg1: memref<8xi32, #tpu.memory_space<smem>>) -> (i32, i32) {
    %c0_i32 = arith.constant 0 : i32
    %c0_i32_0 = arith.constant 0 : i32
    %c0_i32_1 = arith.constant 0 : i32
    return %c0_i32, %c0_i32_0 : i32, i32
  }
}

</mosaic_0001>

<bundles_post_ra>
// kernel: tpu_custom_call.1
= control target key start
LH: loop header
LB: loop body
LE: loop exit
PB: predicated region body
PF: predicated region fallthrough
CT: control target
= control target key end

     0   :  { %s964_s0 = inlined_call_operand.hbm [shape: s32[8], index: 0, kind: input, shape index: {}]   ;;  %s965_s1 = inlined_call_operand.vmem [shape: f32[1,8], index: 1, kind: input, shape index: {}]   ;;  %s966_s2 = inlined_call_operand.vmem [shape: f32[1,384], index: 2, kind: input, shape index: {}]   ;;  %s967_s3 = inlined_call_operand.hbm [shape: f32[512,384], index: 3, kind: input, shape index: {}]   ;;  %s968_s4 = inlined_call_operand.hbm [shape: f32[1,384], index: 4, kind: output, shape index: {}]  }
   0x1   :  { %s491_s17 = scalar_lea.hbm %s964_s0, 16 }
   0x2   :  { %p492_p0 = scmp.ne.s32.totalorder %s964_s0, %s491_s17  ;;  %p495_p1 = scmp.lt.u32.totalorder %s491_s17, %s964_s0 }
   0x4   :  { %p497_p2 = pnand %p495_p1, %p492_p0 }
   0x6   :  { %500 = shalt.err (!%p497_p2)  }
   0x7   :  { %s735_s22 = smov [#allocation5]  }
   0x8   :  { %10 = dma.hbm_to_smem %s964_s0, 16, %s735_s22, [#allocation4] }
   0x9   :  { %715 = dma.done.wait [#allocation4], 16 }
   0xa   :  { %716 = vsyncadd [#allocation4], 4294967280 }
   0xb   :  { %12 = sfence }
   0xc   :  { %13 = vsyncpa [#allocation7], 0  ;;  %s18_s25 = sld [smem:[#allocation5]]  ;;  %s736_s26 = smov [#allocation2]  }
   0xd   :  { %s26_s27 = sshll.u32 %s736_s26, 4  ;;  %s789_s28 = sld [smem:[#allocation5 + $0x1]]  ;;  %s787_s27 = int_to_ptr.vmem [resolvable:$true] %s26_s27 }
   0xe   :  { %s737_s29 = smov [#allocation2 + $0x1]   ;;  %s791_s5 = sld [smem:[#allocation5 + $0x2]] }
   0xf   :  { %s40_s30 = sshll.u32 %s737_s29, 4  ;;  %s738_s8 = smov [#allocation2 + $0x2]   ;;  %s793_s30 = int_to_ptr.vmem [resolvable:$true] %s40_s30 }
  0x10   :  { %s54_s9 = sshll.u32 %s738_s8, 4  ;;  %s797_s10 = sld [smem:[#allocation5 + $0x3]]  ;;  %s795_s9 = int_to_ptr.vmem [resolvable:$true] %s54_s9 }
  0x11   :  { %s807_s22 = scalar_lea.hbm %s967_s3, 24576 }
  0x12   :  { %s19_s0 = sshrl.u32 %s18_s25, 3  ;;  %s20_s6 = sand.u32 7, %s18_s25  }
  0x13   :  { %s21_s7 = smul.u32 24, %s19_s0  ;;  %s31_s12 = sshrl.u32 %s789_s28, 3 }
  0x14   :  { %s32_s14 = sand.u32 7, %s789_s28   ;;  %s33_s18 = smul.u32 24, %s31_s12 }
  0x15   :  { %s22_s11 = sadd.s32 %s21_s7, %s20_s6 }
  0x16   :  { %s444_s13 = sshll.u32 %s22_s11, 4 }
  0x17   :  { %s24_s17 = scalar_lea.hbm %s967_s3, %s444_s13 }
  0x18   :  { %s501_s19 = scalar_lea.hbm %s24_s17, 48  ;;  %p504_p4 = scmp.lt.u32.totalorder %s24_s17, %s967_s3 }
  0x19   :  { %p502_p3 = scmp.ne.s32.totalorder %s24_s17, %s501_s19  ;;  %p505_p5 = scmp.lt.u32.totalorder %s807_s22, %s501_s19 }
  0x1a   :  { %p507_p7 = scmp.lt.u32.totalorder %s501_s19, %s24_s17 }
  0x1b   :  { %p506_p6 = por %p505_p5, %p504_p4 }
  0x1d   :  { %p508_p8 = por %p507_p7, %p506_p6 }
  0x1f   :  { %p509_p9 = pnand %p508_p8, %p502_p3 }
  0x21   :  { %512 = shalt.err (!%p509_p9)  }
  0x22   :  { %s513_s25 = scalar_lea.vmem %s787_s27, 48  ;;  %s816_s26 = scalar_lea.vmem %s787_s27, 384 }
  0x23   :  { %p514_p10 = scmp.ne.s32.totalorder %s787_s27, %s513_s25  ;;  %p518_p11 = scmp.lt.s32.totalorder %s787_s27, %s787_s27 }
  0x24   :  { %p519_p12 = scmp.lt.s32.totalorder %s816_s26, %s513_s25 }
  0x26   :  { %p520_p13 = por %p519_p12, %p518_p11 }
  0x28   :  { %p521_p0 = pnand %p520_p13, %p514_p10 }
  0x2a   :  { %524 = shalt.err (!%p521_p0)  }
  0x2b   :  { %s969_s28 = smov 128   ;;  %s971_s29 = smov 1  }
  0x2c   :  { %29 = dma.hbm_to_vmem [thread:$0]  %s24_s17, 48, %s787_s27, [#allocation3], %s969_s28, %s969_s28, %s971_s29 }
  0x2d   :  { %s34_s0 = sadd.s32 %s33_s18, %s32_s14  ;;  %s45_s6 = sshrl.u32 %s791_s5, 3 }
  0x2e   :  { %s446_s7 = sshll.u32 %s34_s0, 4  ;;  %s46_s8 = sand.u32 7, %s791_s5  }
  0x2f   :  { %s36_s13 = scalar_lea.hbm %s967_s3, %s446_s7  ;;  %s47_s15 = smul.u32 24, %s45_s6 }
  0x30   :  { %s525_s16 = scalar_lea.hbm %s36_s13, 48  ;;  %p528_p2 = scmp.lt.u32.totalorder %s36_s13, %s967_s3 }
  0x31   :  { %p526_p1 = scmp.ne.s32.totalorder %s36_s13, %s525_s16  ;;  %p529_p3 = scmp.lt.u32.totalorder %s807_s22, %s525_s16 }
  0x32   :  { %p531_p5 = scmp.lt.u32.totalorder %s525_s16, %s36_s13 }
  0x33   :  { %p530_p4 = por %p529_p3, %p528_p2 }
  0x35   :  { %p532_p6 = por %p531_p5, %p530_p4 }
  0x37   :  { %p533_p7 = pnand %p532_p6, %p526_p1 }
  0x39   :  { %536 = shalt.err (!%p533_p7)  }
  0x3a   :  { %s537_s5 = scalar_lea.vmem %s793_s30, 48  ;;  %p542_p9 = scmp.lt.s32.totalorder %s793_s30, %s787_s27 }
  0x3b   :  { %p538_p8 = scmp.ne.s32.totalorder %s793_s30, %s537_s5  ;;  %p543_p10 = scmp.lt.s32.totalorder %s816_s26, %s537_s5 }
  0x3d   :  { %p544_p11 = por %p543_p10, %p542_p9 }
  0x3f   :  { %p545_p12 = pnand %p544_p11, %p538_p8 }
  0x41   :  { %548 = shalt.err (!%p545_p12)  }
  0x42   :  { %43 = dma.hbm_to_vmem [thread:$0]  %s36_s13, 48, %s793_s30, [#allocation3 + $0x1], %s969_s28, %s969_s28, %s971_s29 }
  0x43   :  { %s48_s14 = sadd.s32 %s47_s15, %s46_s8  ;;  %s59_s17 = sshrl.u32 %s797_s10, 3 }
  0x44   :  { %s448_s18 = sshll.u32 %s48_s14, 4  ;;  %s60_s21 = sand.u32 7, %s797_s10  }
  0x45   :  { %s50_s25 = scalar_lea.hbm %s967_s3, %s448_s18  ;;  %s61_s0 = smul.u32 24, %s59_s17 }
  0x46   :  { %s549_s6 = scalar_lea.hbm %s50_s25, 48  ;;  %p552_p0 = scmp.lt.u32.totalorder %s50_s25, %s967_s3 }
  0x47   :  { %p550_p13 = scmp.ne.s32.totalorder %s50_s25, %s549_s6  ;;  %p553_p1 = scmp.lt.u32.totalorder %s807_s22, %s549_s6 }
  0x48   :  { %p555_p3 = scmp.lt.u32.totalorder %s549_s6, %s50_s25 }
  0x49   :  { %p554_p2 = por %p553_p1, %p552_p0 }
  0x4b   :  { %p556_p4 = por %p555_p3, %p554_p2 }
  0x4d   :  { %p557_p5 = pnand %p556_p4, %p550_p13 }
  0x4f   :  { %560 = shalt.err (!%p557_p5)  }
  0x50   :  { %s561_s30 = scalar_lea.vmem %s795_s9, 48  ;;  %p566_p7 = scmp.lt.s32.totalorder %s795_s9, %s787_s27 }
  0x51   :  { %p562_p6 = scmp.ne.s32.totalorder %s795_s9, %s561_s30  ;;  %p567_p8 = scmp.lt.s32.totalorder %s816_s26, %s561_s30 }
  0x53   :  { %p568_p9 = por %p567_p8, %p566_p7 }
  0x55   :  { %p569_p10 = pnand %p568_p9, %p562_p6 }
  0x57   :  { %572 = shalt.err (!%p569_p10)  }
  0x58   :  { %57 = dma.hbm_to_vmem [thread:$0]  %s50_s25, 48, %s795_s9, [#allocation3 + $0x2], %s969_s28, %s969_s28, %s971_s29 }
  0x59   :  { %s62_s10 = sadd.s32 %s61_s0, %s60_s21  ;;  %s741_s12 = smov [#allocation2 + $0x3]  }
  0x5a   :  { %s450_s8 = sshll.u32 %s62_s10, 4  ;;  %s68_s13 = sshll.u32 %s741_s12, 4  ;;  %s69_s13 = int_to_ptr.vmem [resolvable:$true] %s68_s13 }
  0x5b   :  { %s64_s19 = scalar_lea.hbm %s967_s3, %s450_s8 }
  0x5c   :  { %s573_s20 = scalar_lea.hbm %s64_s19, 48  ;;  %p576_p12 = scmp.lt.u32.totalorder %s64_s19, %s967_s3 }
  0x5d   :  { %p574_p11 = scmp.ne.s32.totalorder %s64_s19, %s573_s20  ;;  %p577_p13 = scmp.lt.u32.totalorder %s807_s22, %s573_s20 }
  0x5e   :  { %p579_p1 = scmp.lt.u32.totalorder %s573_s20, %s64_s19 }
  0x5f   :  { %p578_p0 = por %p577_p13, %p576_p12 }
  0x61   :  { %p580_p2 = por %p579_p1, %p578_p0 }
  0x63   :  { %p581_p3 = pnand %p580_p2, %p574_p11 }
  0x65   :  { %584 = shalt.err (!%p581_p3)  }
  0x66   :  { %s585_s9 = scalar_lea.vmem %s69_s13, 48  ;;  %p590_p5 = scmp.lt.s32.totalorder %s69_s13, %s787_s27 }
  0x67   :  { %p586_p4 = scmp.ne.s32.totalorder %s69_s13, %s585_s9  ;;  %p591_p6 = scmp.lt.s32.totalorder %s816_s26, %s585_s9 }
  0x69   :  { %p592_p7 = por %p591_p6, %p590_p5 }
  0x6b   :  { %p593_p8 = pnand %p592_p7, %p586_p4 }
  0x6d   :  { %596 = shalt.err (!%p593_p8)  }
  0x6e   :  { %71 = dma.hbm_to_vmem [thread:$0]  %s64_s19, 48, %s69_s13, [#allocation3 + $0x3], %s969_s28, %s969_s28, %s971_s29 }
  0x6f   :  { %s451_s17 = sld [smem:[#allocation5 + $0x4]]  ;;  %s742_s18 = smov [#allocation2 + $0x4]  }
  0x70   :  { %s82_s21 = sshll.u32 %s742_s18, 4  ;;  %s453_s23 = sld [smem:[#allocation5 + $0x5]]  ;;  %s873_s21 = int_to_ptr.vmem [resolvable:$true] %s82_s21 }
  0x71   :  { %s743_s24 = smov [#allocation2 + $0x5]   ;;  %s875_s0 = sld [smem:[#allocation5 + $0x6]] }
  0x72   :  { %s96_s25 = sshll.u32 %s743_s24, 4  ;;  %s744_s6 = smov [#allocation2 + $0x6]   ;;  %s877_s25 = int_to_ptr.vmem [resolvable:$true] %s96_s25 }
  0x73   :  { %s879_s7 = sshll.u32 %s744_s6, 4  ;;  %s881_s11 = sld [smem:[#allocation5 + $0x7]]  ;;  %s111_s7 = int_to_ptr.vmem [resolvable:$true] %s879_s7 }
  0x75   :  { %s73_s30 = sshrl.u32 %s451_s17, 3  ;;  %s74_s10 = sand.u32 7, %s451_s17  }
  0x76   :  { %s75_s8 = smul.u32 24, %s73_s30  ;;  %s87_s12 = sshrl.u32 %s453_s23, 3 }
  0x77   :  { %s88_s13 = sand.u32 7, %s453_s23   ;;  %s89_s15 = smul.u32 24, %s87_s12 }
  0x78   :  { %s76_s16 = sadd.s32 %s75_s8, %s74_s10  ;;  %s101_s19 = sshrl.u32 %s875_s0, 3 }
  0x79   :  { %s452_s20 = sshll.u32 %s76_s16, 4  ;;  %s90_s5 = sadd.s32 %s89_s15, %s88_s13 }
  0x7a   :  { %s78_s18 = scalar_lea.hbm %s967_s3, %s452_s20  ;;  %s454_s24 = sshll.u32 %s90_s5, 4 }
  0x7b   :  { %s597_s6 = scalar_lea.hbm %s78_s18, 48  ;;  %p600_p10 = scmp.lt.u32.totalorder %s78_s18, %s967_s3 }
  0x7c   :  { %p598_p9 = scmp.ne.s32.totalorder %s78_s18, %s597_s6  ;;  %p601_p11 = scmp.lt.u32.totalorder %s807_s22, %s597_s6 }
  0x7d   :  { %p603_p13 = scmp.lt.u32.totalorder %s597_s6, %s78_s18 }
  0x7e   :  { %p602_p12 = por %p601_p11, %p600_p10 }
  0x80   :  { %p604_p0 = por %p603_p13, %p602_p12 }
  0x82   :  { %p605_p1 = pnand %p604_p0, %p598_p9 }
  0x84   :  { %608 = shalt.err (!%p605_p1)  }
  0x85   :  { %s609_s17 = scalar_lea.vmem %s873_s21, 48  ;;  %p614_p3 = scmp.lt.s32.totalorder %s873_s21, %s787_s27 }
  0x86   :  { %p610_p2 = scmp.ne.s32.totalorder %s873_s21, %s609_s17  ;;  %p615_p4 = scmp.lt.s32.totalorder %s816_s26, %s609_s17 }
  0x88   :  { %p616_p5 = por %p615_p4, %p614_p3 }
  0x8a   :  { %p617_p6 = pnand %p616_p5, %p610_p2 }
  0x8c   :  { %620 = shalt.err (!%p617_p6)  }
  0x8d   :  { %s973_s28 = smov 1   ;;  %s974_s29 = smov 128  }
  0x8e   :  { %85 = dma.hbm_to_vmem [thread:$0]  %s78_s18, 48, %s873_s21, [#allocation3 + $0x4], %s974_s29, %s974_s29, %s973_s28 }
  0x8f   :  { %s92_s10 = scalar_lea.hbm %s967_s3, %s454_s24  ;;  %s102_s8 = sand.u32 7, %s875_s0  }
  0x90   :  { %s621_s12 = scalar_lea.hbm %s92_s10, 48  ;;  %p624_p8 = scmp.lt.u32.totalorder %s92_s10, %s967_s3 }
  0x91   :  { %p622_p7 = scmp.ne.s32.totalorder %s92_s10, %s621_s12  ;;  %p625_p9 = scmp.lt.u32.totalorder %s807_s22, %s621_s12 }
  0x92   :  { %p627_p11 = scmp.lt.u32.totalorder %s621_s12, %s92_s10 }
  0x93   :  { %p626_p10 = por %p625_p9, %p624_p8 }
  0x95   :  { %p628_p12 = por %p627_p11, %p626_p10 }
  0x97   :  { %p629_p13 = pnand %p628_p12, %p622_p7 }
  0x99   :  { %632 = shalt.err (!%p629_p13)  }
  0x9a   :  { %s633_s21 = scalar_lea.vmem %s877_s25, 48  ;;  %p638_p1 = scmp.lt.s32.totalorder %s877_s25, %s787_s27 }
  0x9b   :  { %p634_p0 = scmp.ne.s32.totalorder %s877_s25, %s633_s21  ;;  %p639_p2 = scmp.lt.s32.totalorder %s816_s26, %s633_s21 }
  0x9d   :  { %p640_p3 = por %p639_p2, %p638_p1 }
  0x9f   :  { %p641_p4 = pnand %p640_p3, %p634_p0 }
  0xa1   :  { %644 = shalt.err (!%p641_p4)  }
  0xa2   :  { %99 = dma.hbm_to_vmem [thread:$0]  %s92_s10, 48, %s877_s25, [#allocation3 + $0x5], %s974_s29, %s974_s29, %s973_s28 }
  0xa3   :  { %s103_s16 = smul.u32 24, %s101_s19  ;;  %s115_s20 = sshrl.u32 %s881_s11, 3 }
  0xa4   :  { %s116_s5 = sand.u32 7, %s881_s11   ;;  %s117_s9 = smul.u32 24, %s115_s20 }
  0xa5   :  { %s104_s14 = sadd.s32 %s103_s16, %s102_s8 }
  0xa6   :  { %s456_s18 = sshll.u32 %s104_s14, 4  ;;  %s118_s23 = sadd.s32 %s117_s9, %s116_s5 }
  0xa7   :  { %s106_s17 = scalar_lea.hbm %s967_s3, %s456_s18 }
  0xa8   :  { %s645_s30 = scalar_lea.hbm %s106_s17, 48  ;;  %p648_p6 = scmp.lt.u32.totalorder %s106_s17, %s967_s3 }
  0xa9   :  { %p646_p5 = scmp.ne.s32.totalorder %s106_s17, %s645_s30  ;;  %p649_p7 = scmp.lt.u32.totalorder %s807_s22, %s645_s30 }
  0xaa   :  { %p651_p9 = scmp.lt.u32.totalorder %s645_s30, %s106_s17 }
  0xab   :  { %p650_p8 = por %p649_p7, %p648_p6 }
  0xad   :  { %p652_p10 = por %p651_p9, %p650_p8 }
  0xaf   :  { %p653_p11 = pnand %p652_p10, %p646_p5 }
  0xb1   :  { %656 = shalt.err (!%p653_p11)  }
  0xb2   :  { %s657_s25 = scalar_lea.vmem %s111_s7, 48  ;;  %p662_p13 = scmp.lt.s32.totalorder %s111_s7, %s787_s27 }
  0xb3   :  { %p658_p12 = scmp.ne.s32.totalorder %s111_s7, %s657_s25  ;;  %p663_p0 = scmp.lt.s32.totalorder %s816_s26, %s657_s25 }
  0xb5   :  { %p664_p1 = por %p663_p0, %p662_p13 }
  0xb7   :  { %p665_p2 = pnand %p664_p1, %p658_p12 }
  0xb9   :  { %668 = shalt.err (!%p665_p2)  }
  0xba   :  { %113 = dma.hbm_to_vmem [thread:$0]  %s106_s17, 48, %s111_s7, [#allocation3 + $0x6], %s974_s29, %s974_s29, %s973_s28 }
  0xbb   :  { %s458_s0 = sshll.u32 %s118_s23, 4  ;;  %s745_s11 = smov [#allocation2 + $0x7]  }
  0xbc   :  { %s124_s19 = sshll.u32 %s745_s11, 4  ;;  %s120_s15 = scalar_lea.hbm %s967_s3, %s458_s0  ;;  %s125_s19 = int_to_ptr.vmem [resolvable:$true] %s124_s19 }
  0xbd   :  { %s669_s21 = scalar_lea.hbm %s120_s15, 48  ;;  %p672_p4 = scmp.lt.u32.totalorder %s120_s15, %s967_s3 }
  0xbe   :  { %p670_p3 = scmp.ne.s32.totalorder %s120_s15, %s669_s21  ;;  %p673_p5 = scmp.lt.u32.totalorder %s807_s22, %s669_s21 }
  0xbf   :  { %p675_p7 = scmp.lt.u32.totalorder %s669_s21, %s120_s15 }
  0xc0   :  { %p674_p6 = por %p673_p5, %p672_p4 }
  0xc2   :  { %p676_p8 = por %p675_p7, %p674_p6 }
  0xc4   :  { %p677_p9 = pnand %p676_p8, %p670_p3 }
  0xc6   :  { %680 = shalt.err (!%p677_p9)  }
  0xc7   :  { %s681_s7 = scalar_lea.vmem %s125_s19, 48  ;;  %p686_p11 = scmp.lt.s32.totalorder %s125_s19, %s787_s27 }
  0xc8   :  { %p682_p10 = scmp.ne.s32.totalorder %s125_s19, %s681_s7  ;;  %p687_p12 = scmp.lt.s32.totalorder %s816_s26, %s681_s7 }
  0xca   :  { %p688_p13 = por %p687_p12, %p686_p11 }
  0xcc   :  { %p689_p0 = pnand %p688_p13, %p682_p10 }
  0xce   :  { %692 = shalt.err (!%p689_p0)  }
  0xcf   :  { %127 = dma.hbm_to_vmem [thread:$0]  %s120_s15, 48, %s125_s19, [#allocation3 + $0x7], %s974_s29, %s974_s29, %s973_s28 }
  0xd0   :  { %717 = dma.done.wait [#allocation3], 48 }
  0xd1   :  { %718 = vsyncadd [#allocation3], 4294967248 }
  0xd2   :  { %719 = dma.done.wait [#allocation3 + $0x1], 48 }
  0xd3   :  { %720 = vsyncadd [#allocation3 + $0x1], 4294967248 }
  0xd4   :  { %721 = dma.done.wait [#allocation3 + $0x2], 48 }
  0xd5   :  { %722 = vsyncadd [#allocation3 + $0x2], 4294967248 }
  0xd6   :  { %723 = dma.done.wait [#allocation3 + $0x3], 48 }
  0xd7   :  { %724 = vsyncadd [#allocation3 + $0x3], 4294967248 }
  0xd8   :  { %725 = dma.done.wait [#allocation3 + $0x4], 48 }
  0xd9   :  { %726 = vsyncadd [#allocation3 + $0x4], 4294967248 }
  0xda   :  { %727 = dma.done.wait [#allocation3 + $0x5], 48 }
  0xdb   :  { %728 = vsyncadd [#allocation3 + $0x5], 4294967248 }
  0xdc   :  { %729 = dma.done.wait [#allocation3 + $0x6], 48 }
  0xdd   :  { %730 = vsyncadd [#allocation3 + $0x6], 4294967248 }
  0xde   :  { %731 = dma.done.wait [#allocation3 + $0x7], 48 }
  0xdf   :  { %732 = vsyncadd [#allocation3 + $0x7], 4294967248  ;;  %v746_v0 = vmov 0.0   ;;  %vm747_vm0 = vmmov 0   ;;  %v146_v1 = vld [vmem:[#allocation2 + $0x8] sm:$0xff]  ;;  %v145_v2 = vld [vmem:[#allocation2] sm:$0xff]  ;;  %v151_v5 = vlaneseq }
  0xe0   :  { %234 = vmatprep.mubr.f32.mxu0 %v746_v0  ;;  %471 = vmatprep.subr.mxu1 %v746_v0  ;;  %v148_v3 = vld [vmem:[%s965_s1] sm:$0x1]  ;;  %vm166_vm1 = vcmask 64512   ;;  %v147_v4 = vld [vmem:[#allocation2 + $0x10] sm:$0xff]  ;;  %v748_v7 = vmov 1966171168  }
  0xe1   :  { %473 = vmatprep.mubr.msk.f32.mxu1 %vm747_vm0, %v746_v0  ;;  %170 = vmatprep.subr.mxu0 %v146_v1  ;;  %v152_v6 = vshrl.u32 %v151_v5, 7  ;;  %v316_v8 = vunpack.c.l.s4 %v748_v7  ;;  %v149_v11 = vld [vmem:[%s966_s2] sm:$0x7]  ;;  %s749_s1 = smov [#allocation6]   ;;  %vm340_vm2 = vcmp.lt.s32.totalorder %v151_v5, 384 }
  0xe2   :  { %171 = vmatpush1.msra.mxu0 %v145_v2  ;;  %472 = vmatpush3.msra.mxu1 %v147_v4  ;;  %s349_s28 = sshll.u32 %s749_s1, 4  ;;  %s350_s28 = int_to_ptr.vmem [resolvable:$true] %s349_s28 }
  0xe3   :  { %459 = vmatmul.mubr.msk.f32.vlgmr.msra.gmra.mrb[0].mxu0 %vm166_vm1, %v148_v3  ;;  %474 = vmatmul.mubr.msk.f32.vlgmr.msra.gmra.mrb[0].mxu1 %vm166_vm1, %v148_v3  ;;  %v153_v9 = vsub.s32 0, %v152_v6  ;;  %v161_v10 = vsub.s32 2, %v152_v6  ;;  %v157_v12 = vsub.s32 1, %v152_v6  ;;  %v317_v13 = vunpack.c.0.s8 %v316_v8  ;;  %s693_s2 = scalar_lea.vmem %s350_s28, 48  ;;  %s697_s29 = scalar_lea.vmem %s350_s28, 64 }
  0xe4   :  { %p694_p1 = scmp.ne.s32.totalorder %s350_s28, %s693_s2  ;;  %p698_p2 = scmp.lt.s32.totalorder %s350_s28, %s350_s28 }
  0xe5   :  { %v154_v14 = vrot.slane %v149_v11, %v153_v9  ;;  %v162_v15 = vrot.slane %v149_v11, %v161_v10  ;;  %v158_v16 = vrot.slane %v149_v11, %v157_v12  ;;  %v320_v18 = vsub.s32 %v317_v13, %v152_v6  ;;  %p699_p3 = scmp.lt.s32.totalorder %s697_s29, %s693_s2 }
  0xe7   :  { %p700_p4 = por %p699_p3, %p698_p2 }
  0xe9   :  { %p701_p5 = pnand %p700_p4, %p694_p1 }
 0x1b6   :  { %v236_v17 = vpop.f32.mrb[0].mxu0  ;;  %v307_v19 = vpop.f32.mrb[0].mxu1 }
 0x1b7   :  { %v237_v20 = vadd.f32 %v236_v17, %v154_v14  ;;  %v238_v21 = vpop.f32.mrb[1].mxu0  ;;  %v308_v22 = vadd.f32 %v307_v19, %v162_v15  ;;  %v475_v23 = vpop.f32.mrb[1].mxu1 }
 0x1b8   :  { %v239_v24 = vadd.f32 %v238_v21, %v158_v16 }
 0x1b9   :  { %v328_v26 = vrot.slane %v308_v22, %v320_v18 }
 0x1ba   :  { %v314_v25 = vcombine.low %v237_v20, %v239_v24 }
 0x1bc   :  { %v321_v27 = vrot.slane %v314_v25, %v320_v18 }
 0x1be   :  { %v329_v28 = vcombine.low %v321_v27, %v328_v26 }
 0x1c0   :  { %v336_v29 = vrot.slane %v329_v28, %v320_v18 }
 0x1c2   :  { %342 = vst.msk [vmem:[#allocation6] sm:$0x7] %vm340_vm2, %v336_v29 }
 0x1c3   :  { %704 = shalt.err (!%p701_p5)
}
 0x1c4   :  { %s705_s9 = scalar_lea.hbm %s968_s4, 48 }
 0x1c5   :  { %p706_p6 = scmp.ne.s32.totalorder %s968_s4, %s705_s9  ;;  %p709_p7 = scmp.lt.u32.totalorder %s705_s9, %s968_s4 }
 0x1c7   :  { %p711_p8 = pnand %p709_p7, %p706_p6 }
 0x1c9   :  { %714 = shalt.err (!%p711_p8)
}
 0x1ca   :  { %352 = dma.vmem_to_hbm [thread:$0]  %s350_s28, 48, %s968_s4, [#allocation7]  }
 0x1cb   :  { %733 = dma.done.wait [#allocation7], 48  }
 0x1cc   :  { %734 = vsyncadd [#allocation7], 4294967248 }
 0x1cd   :  { %356 = vsyncpa [#allocation7], 1 }
 0x1ce   :  { %357 = vsyncmov [#allocation3] }
 0x1d1   :  { %s358_s12 = vpop.sfrf %357 }
 0x1d2   :  { %p461_p9 = scmp.ne.s32.totalorder %s358_s12, 0 }
 0x1d4   :  { %362 = shalt.err (%p461_p9)  }
 0x1d5   :  { %364 = vsyncmov [#allocation3 + $0x1] }
 0x1d8   :  { %s365_s13 = vpop.sfrf %364 }
 0x1d9   :  { %p462_p10 = scmp.ne.s32.totalorder %s365_s13, 0 }
 0x1db   :  { %369 = shalt.err (%p462_p10)  }
 0x1dc   :  { %371 = vsyncmov [#allocation3 + $0x2] }
 0x1df   :  { %s372_s25 = vpop.sfrf %371 }
 0x1e0   :  { %p463_p11 = scmp.ne.s32.totalorder %s372_s25, 0 }
 0x1e2   :  { %376 = shalt.err (%p463_p11)  }
 0x1e3   :  { %378 = vsyncmov [#allocation3 + $0x3] }
 0x1e6   :  { %s379_s0 = vpop.sfrf %378 }
 0x1e7   :  { %p464_p12 = scmp.ne.s32.totalorder %s379_s0, 0 }
 0x1e9   :  { %383 = shalt.err (%p464_p12)  }
 0x1ea   :  { %385 = vsyncmov [#allocation3 + $0x4] }
 0x1ed   :  { %s386_s4 = vpop.sfrf %385 }
 0x1ee   :  { %p465_p13 = scmp.ne.s32.totalorder %s386_s4, 0 }
 0x1f0   :  { %390 = shalt.err (%p465_p13)  }
 0x1f1   :  { %392 = vsyncmov [#allocation3 + $0x5] }
 0x1f4   :  { %s393_s11 = vpop.sfrf %392 }
 0x1f5   :  { %p466_p0 = scmp.ne.s32.totalorder %s393_s11, 0 }
 0x1f7   :  { %397 = shalt.err (%p466_p0)  }
 0x1f8   :  { %399 = vsyncmov [#allocation3 + $0x6] }
 0x1fb   :  { %s400_s19 = vpop.sfrf %399 }
 0x1fc   :  { %p467_p1 = scmp.ne.s32.totalorder %s400_s19, 0 }
 0x1fe   :  { %404 = shalt.err (%p467_p1)  }
 0x1ff   :  { %406 = vsyncmov [#allocation3 + $0x7] }
 0x202   :  { %s407_s10 = vpop.sfrf %406 }
 0x203   :  { %p468_p2 = scmp.ne.s32.totalorder %s407_s10, 0 }
 0x205   :  { %411 = shalt.err (%p468_p2)  }

</bundles_post_ra>
